<compile_context>
chip_gen: v6e
topology: v6e:2x2x1
jax: 0.10.0
libtpu: 0.0.40
codegen_flags: <defaults>
</compile_context>

<pallas_src>
import functools

import jax
import jax.numpy as jnp
from jax.experimental import pallas as pl
from jax.experimental.pallas import tpu as pltpu


def _layernorm_f32(y, gamma, beta, *, ln_sums_on_mxu, eps=1e-5):
    """LayerNorm with f32 statistics.

    One pass over the tile (sum y, sum y*y); variance clamped at 0 (the one-pass
    form can go slightly negative under cancellation).  When `ln_sums_on_mxu` the
    two row sums are computed as matmuls against a ones column so the cross-lane
    reductions move off the XLU (the binding unit in the small-H regime on
    v6e/v7x) onto the idle MXU.
    """
    h_dim = y.shape[-1]
    if ln_sums_on_mxu:
        ones_col = jnp.ones((h_dim, 1), jnp.float32)
        inv_h = 1.0 / h_dim
        mu = jnp.dot(y, ones_col, preferred_element_type=jnp.float32) * inv_h
        musq = jnp.dot(y * y, ones_col, preferred_element_type=jnp.float32) * inv_h
    else:
        mu = jnp.mean(y, axis=-1, keepdims=True)
        musq = jnp.mean(y * y, axis=-1, keepdims=True)
    var = jnp.maximum(musq - mu * mu, 0.0)
    inv = jax.lax.rsqrt(var + eps)
    return (y - mu) * inv * gamma + beta


def _silu_f32(y):
    """y * sigmoid(y) with sigmoid = 0.5*tanh(y/2)+0.5: one EUP op, no divide."""
    return y * (0.5 * jnp.tanh(0.5 * y) + 0.5)


def _make_kernel(ln_sums_on_mxu):
    def termination_kernel(x_ref, wp_ref, w0_ref, w1_ref, vecs_ref, out_ref):
        # Packed per-feature vectors: one f32 (16, H) slab, rows sliced statically.
        bp, gp, bep = vecs_ref[0:1, :], vecs_ref[1:2, :], vecs_ref[2:3, :]
        b0, g0, be0 = vecs_ref[3:4, :], vecs_ref[4:5, :], vecs_ref[5:6, :]
        b1, g1, be1 = vecs_ref[6:7, :], vecs_ref[7:8, :], vecs_ref[8:9, :]
        wh_row = vecs_ref[9:10, :]          # head weight as a (1, H) row (f32)
        bh = vecs_ref[10:11, 0:1]           # head bias as (1, 1)

        ln = functools.partial(_layernorm_f32, ln_sums_on_mxu=ln_sums_on_mxu)
        w_dtype = wp_ref.dtype              # bf16 weights => bf16 MXU operands

        # h_proj: Linear(D->H) -> LayerNorm.  f32 MXU accumulation throughout.
        x = x_ref[...].astype(w_dtype)
        h = jnp.dot(x, wp_ref[...], preferred_element_type=jnp.float32)
        h = ln(h + bp, gp, bep)

        # backbone layer 0: Linear -> LayerNorm -> SiLU -> Dropout(identity)
        h = jnp.dot(h.astype(w_dtype), w0_ref[...], preferred_element_type=jnp.float32)
        h = _silu_f32(ln(h + b0, g0, be0))

        # backbone layer 1
        h = jnp.dot(h.astype(w_dtype), w1_ref[...], preferred_element_type=jnp.float32)
        h = _silu_f32(ln(h + b1, g1, be1))

        # head: Linear(H -> 1) computed as (1, H) x (tile_n, H)^T so the per-row
        # logits come out lane-dense as (1, tile_n) -> unmasked full-lane stores.
        # Kept in f32 (tiny matmul) so no extra activation cast is needed.
        logits = jax.lax.dot_general(
            wh_row, h,
            dimension_numbers=(((1,), (1,)), ((), ())),
            preferred_element_type=jnp.float32,
        )
        out_ref[...] = (logits + bh).astype(out_ref.dtype)

    return termination_kernel


def _round_up(x, m):
    return ((x + m - 1) // m) * m


def _pick_tile_n(n, tile_n):
    """Effective row-tile size.

    Tiny inputs get a single block whose dims equal the array dims (no (8,128)
    requirement, no padding at all).  Otherwise the tile is a multiple of 128,
    capped so the parallel grid axis has >= 2 steps when there is enough work
    (v7x has 2 TensorCores per chip; a single grid step would idle one of them).
    """
    if n <= 128:
        return n
    t = min(tile_n, _round_up(n, 128))
    while t > 128 and pl.cdiv(n, t) < 2:
        t = max(128, _round_up(t // 2, 128))
    return t


def _vmem_budget_bytes(tile_n, d, h, x_itemsize, w_itemsize, weight_bufs):
    """Rough VMEM footprint: pipeline buffers + f32 intermediates (lane-padded)."""
    d_pad, h_pad, t_pad = max(d, 128), max(h, 128), max(tile_n, 128)
    x_in = 2 * tile_n * d_pad * x_itemsize                    # double-buffered x tile
    wts = weight_bufs * (d_pad * h_pad + 2 * h_pad * h_pad) * w_itemsize
    vecs = weight_bufs * 16 * h_pad * 4                       # packed f32 slab
    out = 2 * 8 * t_pad * x_itemsize                          # (1, tile) out, sublane-padded
    interm = 4 * tile_n * h_pad * 4                           # f32 h / LN / SiLU temporaries
    return x_in + wts + vecs + out + interm


@functools.partial(
    jax.jit,
    static_argnames=("tile_n", "mxu_dtype", "ln_sums_on_mxu", "single_buffer_weights"),
)
def termination_predictor(h_modulated, params, tile_n=512, mxu_dtype=None,
                          ln_sums_on_mxu=False, single_buffer_weights=True):
    """h_modulated: [B, T, D] -> termination logits [B, T]."""
    assert tile_n > 0 and tile_n % 128 == 0, "tile_n must be a positive multiple of 128"
    B, T, D = h_modulated.shape
    N = B * T
    H = params["wp"].shape[1]

    tile = _pick_tile_n(N, tile_n)
    num_tiles = pl.cdiv(N, tile)

    # No wrapper-side padding copy: the last row block may be partial.  Every op in
    # the kernel is row-independent, so unspecified padding rows only produce
    # garbage logits in output columns that Pallas discards on store.
    x2d = h_modulated.reshape(N, D)

    wp, w0, w1 = params["wp"], params["w0"], params["w1"]
    if mxu_dtype is not None:
        # bf16-native MXU path: cast the (small) weights once here; the activation
        # tile is cast in-kernel (no extra HBM pass over x).
        wp, w0, w1 = wp.astype(mxu_dtype), w0.astype(mxu_dtype), w1.astype(mxu_dtype)

    # Pack the per-feature vectors into one f32 (16, H) slab: a single small DMA and
    # no per-step bias/gamma/beta casts inside the kernel body.
    vecs = jnp.concatenate(
        [
            params["bp"], params["gp"], params["bep"],
            params["b0"], params["g0"], params["be0"],
            params["b1"], params["g1"], params["be1"],
            params["wh"].reshape(1, H),
            jnp.broadcast_to(params["bh"].reshape(1, 1), (1, H)),
            jnp.zeros((5, H), params["bp"].dtype),
        ],
        axis=0,
    ).astype(jnp.float32)

    weight_bufs = 1 if single_buffer_weights else 2
    budget = _vmem_budget_bytes(tile, D, H, x2d.dtype.itemsize, wp.dtype.itemsize,
                                weight_bufs)
    # +25% headroom, floor 32 MiB, cap 64 MiB (v7x per-TC physical).  If the budget
    # ever exceeds the cap, K-tile the weights instead (see TODO at top of file).
    vmem_limit = int(min(max(budget * 5 // 4, 32 * 1024 * 1024), 64 * 1024 * 1024))

    def _const_spec(shape):
        # Constant index_map -> the block never changes; single-buffer it so the
        # weights are resident exactly once in VMEM.
        if single_buffer_weights:
            return pl.BlockSpec(shape, lambda i: (0, 0),
                                pipeline_mode=pl.Buffered(buffer_count=1))
        return pl.BlockSpec(shape, lambda i: (0, 0))

    out = pl.pallas_call(
        _make_kernel(ln_sums_on_mxu),
        out_shape=jax.ShapeDtypeStruct((1, N), h_modulated.dtype),
        grid=(num_tiles,),
        in_specs=[
            pl.BlockSpec((tile, D), lambda i: (i, 0)),   # x row tile
            _const_spec((D, H)),                         # wp
            _const_spec((H, H)),                         # w0
            _const_spec((H, H)),                         # w1
            _const_spec((16, H)),                        # packed f32 vectors
        ],
        out_specs=pl.BlockSpec((1, tile), lambda i: (0, i)),   # lane-dense logits
        compiler_params=pltpu.CompilerParams(
            dimension_semantics=("parallel",),
            vmem_limit_bytes=vmem_limit,
        ),
    )(x2d, wp, w0, w1, vecs)

    return out.reshape(B, T)


def init_params(key, hidden_state_dim, hidden_units, dtype=jnp.float32):
    """Deterministic synthetic init (module shapes; weights stored as [in, out])."""
    ks = jax.random.split(key, 4)
    scale_p = 1.0 / jnp.sqrt(hidden_state_dim)
    scale_h = 1.0 / jnp.sqrt(hidden_units)
    H = hidden_units
    return {
        # h_proj: Linear(D, H) + LayerNorm(H)
        "wp": (jax.random.normal(ks[0], (hidden_state_dim, H)) * scale_p).astype(dtype),
        "bp": jnp.zeros((1, H), dtype),
        "gp": jnp.ones((1, H), dtype),
        "bep": jnp.zeros((1, H), dtype),
        # backbone layer 0
        "w0": (jax.random.normal(ks[1], (H, H)) * scale_h).astype(dtype),
        "b0": jnp.zeros((1, H), dtype),
        "g0": jnp.ones((1, H), dtype),
        "be0": jnp.zeros((1, H), dtype),
        # backbone layer 1
        "w1": (jax.random.normal(ks[2], (H, H)) * scale_h).astype(dtype),
        "b1": jnp.zeros((1, H), dtype),
        "g1": jnp.ones((1, H), dtype),
        "be1": jnp.zeros((1, H), dtype),
        # head: Linear(H, 1)
        "wh": (jax.random.normal(ks[3], (H, 1)) * scale_h).astype(dtype),
        "bh": jnp.zeros((1, 1), dtype),
    }


def _reference(h_modulated, p):
    """Pure-JAX reference for sanity checking."""
    def ln(y, g, b, eps=1e-5):
        mu = jnp.mean(y, axis=-1, keepdims=True)
        var = jnp.mean((y - mu) ** 2, axis=-1, keepdims=True)
        return (y - mu) * jax.lax.rsqrt(var + eps) * g + b

    def silu(y):
        return y / (1.0 + jnp.exp(-y))

    x = h_modulated.astype(jnp.float32)
    h = ln(x @ p["wp"] + p["bp"], p["gp"], p["bep"])
    h = silu(ln(h @ p["w0"] + p["b0"], p["g0"], p["be0"]))
    h = silu(ln(h @ p["w1"] + p["b1"], p["g1"], p["be1"]))
    out = h @ p["wh"] + p["bh"]
    return out[..., 0].astype(h_modulated.dtype)


if __name__ == "__main__":
    B, T = 2, 8
    hidden_state_dim = 32
    hidden_units = 32

    key = jax.random.PRNGKey(0)
    k_x, k_p = jax.random.split(key)
    h_modulated = jax.random.normal(k_x, (B, T, hidden_state_dim), jnp.float32)
    params = init_params(k_p, hidden_state_dim, hidden_units)

    def run(**kw):
        return jax.block_until_ready(termination_predictor(h_modulated, params, **kw))

    # Single-buffered constant weight blocks (pl.Buffered(1), perf-review item); fall
    # back to default double buffering if this jax build's TPU pallas_call path does
    # not accept pipeline_mode on BlockSpec.
    try:
        termination = run(single_buffer_weights=True)
        sbw = True
    except Exception:
        termination = run(single_buffer_weights=False)
        sbw = False

    ref = _reference(h_modulated, params)
    assert termination.shape == (B, T)
    assert jnp.allclose(termination, ref, atol=2e-4, rtol=2e-4), (
        float(jnp.max(jnp.abs(termination - ref)))
    )

    # Exercise the production knobs from the perf review: bf16 MXU operands and
    # MXU-routed LayerNorm row sums (XLU-bound small-H regime).  Looser tolerance
    # because of the bf16 operand rounding.
    termination_fast = run(mxu_dtype=jnp.bfloat16, ln_sums_on_mxu=True,
                           single_buffer_weights=sbw)
    assert termination_fast.shape == (B, T)
    assert jnp.allclose(termination_fast, ref, atol=1e-1, rtol=1e-1), (
        float(jnp.max(jnp.abs(termination_fast - ref)))
    )

    print("KERNEL_OK")
</pallas_src>

<mosaic_0001>
module attributes {stable_mosaic.version = 11 : i64} {
  func.func @termination_kernel(%arg0: i32, %arg1: memref<16x32xf32, #tpu.memory_space<vmem>>, %arg2: memref<32x32xf32, #tpu.memory_space<vmem>>, %arg3: memref<32x32xf32, #tpu.memory_space<vmem>>, %arg4: memref<32x32xf32, #tpu.memory_space<vmem>>, %arg5: memref<16x32xf32, #tpu.memory_space<vmem>>, %arg6: memref<1x16xf32, #tpu.memory_space<vmem>>) attributes {dimension_semantics = [#tpu.dimension_semantics<parallel>], iteration_bounds = array<i64: 1>, scalar_prefetch = 0 : i64, scratch_operands = 0 : i64, tpu.core_type = #tpu.core_type<tc>, window_params = [{transform_indices = @transform_0, window_bounds = array<i64: 16, 32>}, {pipeline_mode = #tpu.pipeline_mode<synchronous>, transform_indices = @transform_1, window_bounds = array<i64: 32, 32>}, {pipeline_mode = #tpu.pipeline_mode<synchronous>, transform_indices = @transform_2, window_bounds = array<i64: 32, 32>}, {pipeline_mode = #tpu.pipeline_mode<synchronous>, transform_indices = @transform_3, window_bounds = array<i64: 32, 32>}, {pipeline_mode = #tpu.pipeline_mode<synchronous>, transform_indices = @transform_4, window_bounds = array<i64: 16, 32>}, {transform_indices = @transform_5, window_bounds = array<i64: 1, 16>}]} {
    %c0 = arith.constant 0 : index
    %c0_0 = arith.constant 0 : index
    %0 = vector.load %arg5[%c0, %c0_0] : memref<16x32xf32, #tpu.memory_space<vmem>>, vector<1x32xf32>
    %c1 = arith.constant 1 : index
    %c0_1 = arith.constant 0 : index
    %1 = vector.load %arg5[%c1, %c0_1] : memref<16x32xf32, #tpu.memory_space<vmem>>, vector<1x32xf32>
    %c2 = arith.constant 2 : index
    %c0_2 = arith.constant 0 : index
    %2 = vector.load %arg5[%c2, %c0_2] : memref<16x32xf32, #tpu.memory_space<vmem>>, vector<1x32xf32>
    %c3 = arith.constant 3 : index
    %c0_3 = arith.constant 0 : index
    %3 = vector.load %arg5[%c3, %c0_3] : memref<16x32xf32, #tpu.memory_space<vmem>>, vector<1x32xf32>
    %c4 = arith.constant 4 : index
    %c0_4 = arith.constant 0 : index
    %4 = vector.load %arg5[%c4, %c0_4] : memref<16x32xf32, #tpu.memory_space<vmem>>, vector<1x32xf32>
    %c5 = arith.constant 5 : index
    %c0_5 = arith.constant 0 : index
    %5 = vector.load %arg5[%c5, %c0_5] : memref<16x32xf32, #tpu.memory_space<vmem>>, vector<1x32xf32>
    %c6 = arith.constant 6 : index
    %c0_6 = arith.constant 0 : index
    %6 = vector.load %arg5[%c6, %c0_6] : memref<16x32xf32, #tpu.memory_space<vmem>>, vector<1x32xf32>
    %c7 = arith.constant 7 : index
    %c0_7 = arith.constant 0 : index
    %7 = vector.load %arg5[%c7, %c0_7] : memref<16x32xf32, #tpu.memory_space<vmem>>, vector<1x32xf32>
    %c8 = arith.constant 8 : index
    %c0_8 = arith.constant 0 : index
    %8 = vector.load %arg5[%c8, %c0_8] : memref<16x32xf32, #tpu.memory_space<vmem>>, vector<1x32xf32>
    %c9 = arith.constant 9 : index
    %c0_9 = arith.constant 0 : index
    %9 = vector.load %arg5[%c9, %c0_9] : memref<16x32xf32, #tpu.memory_space<vmem>>, vector<1x32xf32>
    %c10 = arith.constant 10 : index
    %c0_10 = arith.constant 0 : index
    %10 = vector.load %arg5[%c10, %c0_10] : memref<16x32xf32, #tpu.memory_space<vmem>>, vector<1x1xf32>
    %c0_11 = arith.constant 0 : index
    %c0_12 = arith.constant 0 : index
    %11 = vector.load %arg1[%c0_11, %c0_12] : memref<16x32xf32, #tpu.memory_space<vmem>>, vector<16x32xf32>
    %c0_13 = arith.constant 0 : index
    %c0_14 = arith.constant 0 : index
    %12 = vector.load %arg2[%c0_13, %c0_14] : memref<32x32xf32, #tpu.memory_space<vmem>>, vector<32x32xf32>
    %cst = arith.constant dense<0.000000e+00> : vector<16x32xf32>
    %13 = tpu.matmul %11, %12, %cst {dimension_numbers = #tpu.dot_dimension_numbers<[1], [0], [0], [1], [0, 0, 1, 1], [], []>} : vector<16x32xf32>, vector<32x32xf32>, vector<16x32xf32> -> vector<16x32xf32>
    %14 = vector.broadcast %0 : vector<1x32xf32> to vector<16x32xf32>
    %15 = arith.addf %13, %14 : vector<16x32xf32>
    %cst_15 = arith.constant dense<0.000000e+00> : vector<16xf32>
    %16 = vector.multi_reduction <add>, %15, %cst_15 [1] : vector<16x32xf32> to vector<16xf32>
    %17 = vector.shape_cast %16 : vector<16xf32> to vector<16x1xf32>
    %cst_16 = arith.constant 3.200000e+01 : f32
    %18 = vector.broadcast %cst_16 : f32 to vector<16x1xf32>
    %19 = arith.divf %17, %18 : vector<16x1xf32>
    %20 = arith.mulf %15, %15 : vector<16x32xf32>
    %cst_17 = arith.constant dense<0.000000e+00> : vector<16xf32>
    %21 = vector.multi_reduction <add>, %20, %cst_17 [1] : vector<16x32xf32> to vector<16xf32>
    %22 = vector.shape_cast %21 : vector<16xf32> to vector<16x1xf32>
    %cst_18 = arith.constant 3.200000e+01 : f32
    %23 = vector.broadcast %cst_18 : f32 to vector<16x1xf32>
    %24 = arith.divf %22, %23 : vector<16x1xf32>
    %25 = arith.mulf %19, %19 : vector<16x1xf32>
    %26 = arith.subf %24, %25 : vector<16x1xf32>
    %cst_19 = arith.constant 0.000000e+00 : f32
    %27 = vector.broadcast %cst_19 : f32 to vector<16x1xf32>
    %28 = arith.maximumf %26, %27 : vector<16x1xf32>
    %cst_20 = arith.constant 9.99999974E-6 : f32
    %29 = vector.broadcast %cst_20 : f32 to vector<16x1xf32>
    %30 = arith.addf %28, %29 : vector<16x1xf32>
    %31 = math.rsqrt %30 : vector<16x1xf32>
    %32 = vector.broadcast %19 : vector<16x1xf32> to vector<16x32xf32>
    %33 = arith.subf %15, %32 : vector<16x32xf32>
    %34 = vector.broadcast %31 : vector<16x1xf32> to vector<16x32xf32>
    %35 = arith.mulf %33, %34 : vector<16x32xf32>
    %36 = vector.broadcast %1 : vector<1x32xf32> to vector<16x32xf32>
    %37 = arith.mulf %35, %36 : vector<16x32xf32>
    %38 = vector.broadcast %2 : vector<1x32xf32> to vector<16x32xf32>
    %39 = arith.addf %37, %38 : vector<16x32xf32>
    %c0_21 = arith.constant 0 : index
    %c0_22 = arith.constant 0 : index
    %40 = vector.load %arg3[%c0_21, %c0_22] : memref<32x32xf32, #tpu.memory_space<vmem>>, vector<32x32xf32>
    %cst_23 = arith.constant dense<0.000000e+00> : vector<16x32xf32>
    %41 = tpu.matmul %39, %40, %cst_23 {dimension_numbers = #tpu.dot_dimension_numbers<[1], [0], [0], [1], [0, 0, 1, 1], [], []>} : vector<16x32xf32>, vector<32x32xf32>, vector<16x32xf32> -> vector<16x32xf32>
    %42 = vector.broadcast %3 : vector<1x32xf32> to vector<16x32xf32>
    %43 = arith.addf %41, %42 : vector<16x32xf32>
    %cst_24 = arith.constant dense<0.000000e+00> : vector<16xf32>
    %44 = vector.multi_reduction <add>, %43, %cst_24 [1] : vector<16x32xf32> to vector<16xf32>
    %45 = vector.shape_cast %44 : vector<16xf32> to vector<16x1xf32>
    %cst_25 = arith.constant 3.200000e+01 : f32
    %46 = vector.broadcast %cst_25 : f32 to vector<16x1xf32>
    %47 = arith.divf %45, %46 : vector<16x1xf32>
    %48 = arith.mulf %43, %43 : vector<16x32xf32>
    %cst_26 = arith.constant dense<0.000000e+00> : vector<16xf32>
    %49 = vector.multi_reduction <add>, %48, %cst_26 [1] : vector<16x32xf32> to vector<16xf32>
    %50 = vector.shape_cast %49 : vector<16xf32> to vector<16x1xf32>
    %cst_27 = arith.constant 3.200000e+01 : f32
    %51 = vector.broadcast %cst_27 : f32 to vector<16x1xf32>
    %52 = arith.divf %50, %51 : vector<16x1xf32>
    %53 = arith.mulf %47, %47 : vector<16x1xf32>
    %54 = arith.subf %52, %53 : vector<16x1xf32>
    %cst_28 = arith.constant 0.000000e+00 : f32
    %55 = vector.broadcast %cst_28 : f32 to vector<16x1xf32>
    %56 = arith.maximumf %54, %55 : vector<16x1xf32>
    %cst_29 = arith.constant 9.99999974E-6 : f32
    %57 = vector.broadcast %cst_29 : f32 to vector<16x1xf32>
    %58 = arith.addf %56, %57 : vector<16x1xf32>
    %59 = math.rsqrt %58 : vector<16x1xf32>
    %60 = vector.broadcast %47 : vector<16x1xf32> to vector<16x32xf32>
    %61 = arith.subf %43, %60 : vector<16x32xf32>
    %62 = vector.broadcast %59 : vector<16x1xf32> to vector<16x32xf32>
    %63 = arith.mulf %61, %62 : vector<16x32xf32>
    %64 = vector.broadcast %4 : vector<1x32xf32> to vector<16x32xf32>
    %65 = arith.mulf %63, %64 : vector<16x32xf32>
    %66 = vector.broadcast %5 : vector<1x32xf32> to vector<16x32xf32>
    %67 = arith.addf %65, %66 : vector<16x32xf32>
    %cst_30 = arith.constant 5.000000e-01 : f32
    %68 = vector.broadcast %cst_30 : f32 to vector<16x32xf32>
    %69 = arith.mulf %68, %67 : vector<16x32xf32>
    %70 = math.tanh %69 : vector<16x32xf32>
    %cst_31 = arith.constant 5.000000e-01 : f32
    %71 = vector.broadcast %cst_31 : f32 to vector<16x32xf32>
    %72 = arith.mulf %71, %70 : vector<16x32xf32>
    %cst_32 = arith.constant 5.000000e-01 : f32
    %73 = vector.broadcast %cst_32 : f32 to vector<16x32xf32>
    %74 = arith.addf %72, %73 : vector<16x32xf32>
    %75 = arith.mulf %67, %74 : vector<16x32xf32>
    %c0_33 = arith.constant 0 : index
    %c0_34 = arith.constant 0 : index
    %76 = vector.load %arg4[%c0_33, %c0_34] : memref<32x32xf32, #tpu.memory_space<vmem>>, vector<32x32xf32>
    %cst_35 = arith.constant dense<0.000000e+00> : vector<16x32xf32>
    %77 = tpu.matmul %75, %76, %cst_35 {dimension_numbers = #tpu.dot_dimension_numbers<[1], [0], [0], [1], [0, 0, 1, 1], [], []>} : vector<16x32xf32>, vector<32x32xf32>, vector<16x32xf32> -> vector<16x32xf32>
    %78 = vector.broadcast %6 : vector<1x32xf32> to vector<16x32xf32>
    %79 = arith.addf %77, %78 : vector<16x32xf32>
    %cst_36 = arith.constant dense<0.000000e+00> : vector<16xf32>
    %80 = vector.multi_reduction <add>, %79, %cst_36 [1] : vector<16x32xf32> to vector<16xf32>
    %81 = vector.shape_cast %80 : vector<16xf32> to vector<16x1xf32>
    %cst_37 = arith.constant 3.200000e+01 : f32
    %82 = vector.broadcast %cst_37 : f32 to vector<16x1xf32>
    %83 = arith.divf %81, %82 : vector<16x1xf32>
    %84 = arith.mulf %79, %79 : vector<16x32xf32>
    %cst_38 = arith.constant dense<0.000000e+00> : vector<16xf32>
    %85 = vector.multi_reduction <add>, %84, %cst_38 [1] : vector<16x32xf32> to vector<16xf32>
    %86 = vector.shape_cast %85 : vector<16xf32> to vector<16x1xf32>
    %cst_39 = arith.constant 3.200000e+01 : f32
    %87 = vector.broadcast %cst_39 : f32 to vector<16x1xf32>
    %88 = arith.divf %86, %87 : vector<16x1xf32>
    %89 = arith.mulf %83, %83 : vector<16x1xf32>
    %90 = arith.subf %88, %89 : vector<16x1xf32>
    %cst_40 = arith.constant 0.000000e+00 : f32
    %91 = vector.broadcast %cst_40 : f32 to vector<16x1xf32>
    %92 = arith.maximumf %90, %91 : vector<16x1xf32>
    %cst_41 = arith.constant 9.99999974E-6 : f32
    %93 = vector.broadcast %cst_41 : f32 to vector<16x1xf32>
    %94 = arith.addf %92, %93 : vector<16x1xf32>
    %95 = math.rsqrt %94 : vector<16x1xf32>
    %96 = vector.broadcast %83 : vector<16x1xf32> to vector<16x32xf32>
    %97 = arith.subf %79, %96 : vector<16x32xf32>
    %98 = vector.broadcast %95 : vector<16x1xf32> to vector<16x32xf32>
    %99 = arith.mulf %97, %98 : vector<16x32xf32>
    %100 = vector.broadcast %7 : vector<1x32xf32> to vector<16x32xf32>
    %101 = arith.mulf %99, %100 : vector<16x32xf32>
    %102 = vector.broadcast %8 : vector<1x32xf32> to vector<16x32xf32>
    %103 = arith.addf %101, %102 : vector<16x32xf32>
    %cst_42 = arith.constant 5.000000e-01 : f32
    %104 = vector.broadcast %cst_42 : f32 to vector<16x32xf32>
    %105 = arith.mulf %104, %103 : vector<16x32xf32>
    %106 = math.tanh %105 : vector<16x32xf32>
    %cst_43 = arith.constant 5.000000e-01 : f32
    %107 = vector.broadcast %cst_43 : f32 to vector<16x32xf32>
    %108 = arith.mulf %107, %106 : vector<16x32xf32>
    %cst_44 = arith.constant 5.000000e-01 : f32
    %109 = vector.broadcast %cst_44 : f32 to vector<16x32xf32>
    %110 = arith.addf %108, %109 : vector<16x32xf32>
    %111 = arith.mulf %103, %110 : vector<16x32xf32>
    %cst_45 = arith.constant dense<0.000000e+00> : vector<1x16xf32>
    %112 = tpu.matmul %9, %111, %cst_45 {dimension_numbers = #tpu.dot_dimension_numbers<[1], [1], [0], [0], [0, 0, 1, 0], [], []>} : vector<1x32xf32>, vector<16x32xf32>, vector<1x16xf32> -> vector<1x16xf32>
    %113 = vector.broadcast %10 : vector<1x1xf32> to vector<1x16xf32>
    %114 = arith.addf %112, %113 : vector<1x16xf32>
    %c0_46 = arith.constant 0 : index
    %c0_47 = arith.constant 0 : index
    %115 = vector.load %arg6[%c0_46, %c0_47] : memref<1x16xf32, #tpu.memory_space<vmem>>, vector<1x16xf32>
    tpu.vector_store %arg6[%c0_46, %c0_47], %114 {strides = array<i32>} : memref<1x16xf32, #tpu.memory_space<vmem>>, vector<1x16xf32>,
    return
  }
  func.func @transform_0(%arg0: i32) -> (i32, i32) {
    %c0_i32 = arith.constant 0 : i32
    %c0_i32_0 = arith.constant 0 : i32
    return %arg0, %c0_i32 : i32, i32
  }
  func.func @transform_1(%arg0: i32) -> (i32, i32) {
    %c0_i32 = arith.constant 0 : i32
    %c0_i32_0 = arith.constant 0 : i32
    %c0_i32_1 = arith.constant 0 : i32
    return %c0_i32, %c0_i32_0 : i32, i32
  }
  func.func @transform_2(%arg0: i32) -> (i32, i32) {
    %c0_i32 = arith.constant 0 : i32
    %c0_i32_0 = arith.constant 0 : i32
    %c0_i32_1 = arith.constant 0 : i32
    return %c0_i32, %c0_i32_0 : i32, i32
  }
  func.func @transform_3(%arg0: i32) -> (i32, i32) {
    %c0_i32 = arith.constant 0 : i32
    %c0_i32_0 = arith.constant 0 : i32
    %c0_i32_1 = arith.constant 0 : i32
    return %c0_i32, %c0_i32_0 : i32, i32
  }
  func.func @transform_4(%arg0: i32) -> (i32, i32) {
    %c0_i32 = arith.constant 0 : i32
    %c0_i32_0 = arith.constant 0 : i32
    %c0_i32_1 = arith.constant 0 : i32
    return %c0_i32, %c0_i32_0 : i32, i32
  }
  func.func @transform_5(%arg0: i32) -> (i32, i32) {
    %c0_i32 = arith.constant 0 : i32
    %c0_i32_0 = arith.constant 0 : i32
    return %c0_i32, %arg0 : i32, i32
  }
}

module attributes {stable_mosaic.version = 11 : i64} {
  func.func @termination_kernel(%arg0: i32, %arg1: memref<16x32xf32, #tpu.memory_space<vmem>>, %arg2: memref<32x32xf32, #tpu.memory_space<vmem>>, %arg3: memref<32x32xf32, #tpu.memory_space<vmem>>, %arg4: memref<32x32xf32, #tpu.memory_space<vmem>>, %arg5: memref<16x32xf32, #tpu.memory_space<vmem>>, %arg6: memref<1x16xf32, #tpu.memory_space<vmem>>) attributes {dimension_semantics = [#tpu.dimension_semantics<parallel>], iteration_bounds = array<i64: 1>, scalar_prefetch = 0 : i64, scratch_operands = 0 : i64, tpu.core_type = #tpu.core_type<tc>, window_params = [{transform_indices = @transform_0, window_bounds = array<i64: 16, 32>}, {pipeline_mode = #tpu.pipeline_mode<synchronous>, transform_indices = @transform_1, window_bounds = array<i64: 32, 32>}, {pipeline_mode = #tpu.pipeline_mode<synchronous>, transform_indices = @transform_2, window_bounds = array<i64: 32, 32>}, {pipeline_mode = #tpu.pipeline_mode<synchronous>, transform_indices = @transform_3, window_bounds = array<i64: 32, 32>}, {pipeline_mode = #tpu.pipeline_mode<synchronous>, transform_indices = @transform_4, window_bounds = array<i64: 16, 32>}, {transform_indices = @transform_5, window_bounds = array<i64: 1, 16>}]} {
    %c0 = arith.constant 0 : index
    %c0_0 = arith.constant 0 : index
    %0 = vector.load %arg5[%c0, %c0_0] : memref<16x32xf32, #tpu.memory_space<vmem>>, vector<1x32xf32>
    %c1 = arith.constant 1 : index
    %c0_1 = arith.constant 0 : index
    %1 = vector.load %arg5[%c1, %c0_1] : memref<16x32xf32, #tpu.memory_space<vmem>>, vector<1x32xf32>
    %c2 = arith.constant 2 : index
    %c0_2 = arith.constant 0 : index
    %2 = vector.load %arg5[%c2, %c0_2] : memref<16x32xf32, #tpu.memory_space<vmem>>, vector<1x32xf32>
    %c3 = arith.constant 3 : index
    %c0_3 = arith.constant 0 : index
    %3 = vector.load %arg5[%c3, %c0_3] : memref<16x32xf32, #tpu.memory_space<vmem>>, vector<1x32xf32>
    %c4 = arith.constant 4 : index
    %c0_4 = arith.constant 0 : index
    %4 = vector.load %arg5[%c4, %c0_4] : memref<16x32xf32, #tpu.memory_space<vmem>>, vector<1x32xf32>
    %c5 = arith.constant 5 : index
    %c0_5 = arith.constant 0 : index
    %5 = vector.load %arg5[%c5, %c0_5] : memref<16x32xf32, #tpu.memory_space<vmem>>, vector<1x32xf32>
    %c6 = arith.constant 6 : index
    %c0_6 = arith.constant 0 : index
    %6 = vector.load %arg5[%c6, %c0_6] : memref<16x32xf32, #tpu.memory_space<vmem>>, vector<1x32xf32>
    %c7 = arith.constant 7 : index
    %c0_7 = arith.constant 0 : index
    %7 = vector.load %arg5[%c7, %c0_7] : memref<16x32xf32, #tpu.memory_space<vmem>>, vector<1x32xf32>
    %c8 = arith.constant 8 : index
    %c0_8 = arith.constant 0 : index
    %8 = vector.load %arg5[%c8, %c0_8] : memref<16x32xf32, #tpu.memory_space<vmem>>, vector<1x32xf32>
    %c9 = arith.constant 9 : index
    %c0_9 = arith.constant 0 : index
    %9 = vector.load %arg5[%c9, %c0_9] : memref<16x32xf32, #tpu.memory_space<vmem>>, vector<1x32xf32>
    %c10 = arith.constant 10 : index
    %c0_10 = arith.constant 0 : index
    %10 = vector.load %arg5[%c10, %c0_10] : memref<16x32xf32, #tpu.memory_space<vmem>>, vector<1x1xf32>
    %c0_11 = arith.constant 0 : index
    %c0_12 = arith.constant 0 : index
    %11 = vector.load %arg1[%c0_11, %c0_12] : memref<16x32xf32, #tpu.memory_space<vmem>>, vector<16x32xf32>
    %c0_13 = arith.constant 0 : index
    %c0_14 = arith.constant 0 : index
    %12 = vector.load %arg2[%c0_13, %c0_14] : memref<32x32xf32, #tpu.memory_space<vmem>>, vector<32x32xf32>
    %cst = arith.constant dense<0.000000e+00> : vector<16x32xf32>
    %13 = tpu.matmul %11, %12, %cst {dimension_numbers = #tpu.dot_dimension_numbers<[1], [0], [0], [1], [0, 0, 1, 1], [], []>} : vector<16x32xf32>, vector<32x32xf32>, vector<16x32xf32> -> vector<16x32xf32>
    %14 = vector.broadcast %0 : vector<1x32xf32> to vector<16x32xf32>
    %15 = arith.addf %13, %14 : vector<16x32xf32>
    %cst_15 = arith.constant dense<0.000000e+00> : vector<16xf32>
    %16 = vector.multi_reduction <add>, %15, %cst_15 [1] : vector<16x32xf32> to vector<16xf32>
    %17 = vector.shape_cast %16 : vector<16xf32> to vector<16x1xf32>
    %cst_16 = arith.constant 3.200000e+01 : f32
    %18 = vector.broadcast %cst_16 : f32 to vector<16x1xf32>
    %19 = arith.divf %17, %18 : vector<16x1xf32>
    %20 = arith.mulf %15, %15 : vector<16x32xf32>
    %cst_17 = arith.constant dense<0.000000e+00> : vector<16xf32>
    %21 = vector.multi_reduction <add>, %20, %cst_17 [1] : vector<16x32xf32> to vector<16xf32>
    %22 = vector.shape_cast %21 : vector<16xf32> to vector<16x1xf32>
    %cst_18 = arith.constant 3.200000e+01 : f32
    %23 = vector.broadcast %cst_18 : f32 to vector<16x1xf32>
    %24 = arith.divf %22, %23 : vector<16x1xf32>
    %25 = arith.mulf %19, %19 : vector<16x1xf32>
    %26 = arith.subf %24, %25 : vector<16x1xf32>
    %cst_19 = arith.constant 0.000000e+00 : f32
    %27 = vector.broadcast %cst_19 : f32 to vector<16x1xf32>
    %28 = arith.maximumf %26, %27 : vector<16x1xf32>
    %cst_20 = arith.constant 9.99999974E-6 : f32
    %29 = vector.broadcast %cst_20 : f32 to vector<16x1xf32>
    %30 = arith.addf %28, %29 : vector<16x1xf32>
    %31 = math.rsqrt %30 : vector<16x1xf32>
    %32 = vector.broadcast %19 : vector<16x1xf32> to vector<16x32xf32>
    %33 = arith.subf %15, %32 : vector<16x32xf32>
    %34 = vector.broadcast %31 : vector<16x1xf32> to vector<16x32xf32>
    %35 = arith.mulf %33, %34 : vector<16x32xf32>
    %36 = vector.broadcast %1 : vector<1x32xf32> to vector<16x32xf32>
    %37 = arith.mulf %35, %36 : vector<16x32xf32>
    %38 = vector.broadcast %2 : vector<1x32xf32> to vector<16x32xf32>
    %39 = arith.addf %37, %38 : vector<16x32xf32>
    %c0_21 = arith.constant 0 : index
    %c0_22 = arith.constant 0 : index
    %40 = vector.load %arg3[%c0_21, %c0_22] : memref<32x32xf32, #tpu.memory_space<vmem>>, vector<32x32xf32>
    %cst_23 = arith.constant dense<0.000000e+00> : vector<16x32xf32>
    %41 = tpu.matmul %39, %40, %cst_23 {dimension_numbers = #tpu.dot_dimension_numbers<[1], [0], [0], [1], [0, 0, 1, 1], [], []>} : vector<16x32xf32>, vector<32x32xf32>, vector<16x32xf32> -> vector<16x32xf32>
    %42 = vector.broadcast %3 : vector<1x32xf32> to vector<16x32xf32>
    %43 = arith.addf %41, %42 : vector<16x32xf32>
    %cst_24 = arith.constant dense<0.000000e+00> : vector<16xf32>
    %44 = vector.multi_reduction <add>, %43, %cst_24 [1] : vector<16x32xf32> to vector<16xf32>
    %45 = vector.shape_cast %44 : vector<16xf32> to vector<16x1xf32>
    %cst_25 = arith.constant 3.200000e+01 : f32
    %46 = vector.broadcast %cst_25 : f32 to vector<16x1xf32>
    %47 = arith.divf %45, %46 : vector<16x1xf32>
    %48 = arith.mulf %43, %43 : vector<16x32xf32>
    %cst_26 = arith.constant dense<0.000000e+00> : vector<16xf32>
    %49 = vector.multi_reduction <add>, %48, %cst_26 [1] : vector<16x32xf32> to vector<16xf32>
    %50 = vector.shape_cast %49 : vector<16xf32> to vector<16x1xf32>
    %cst_27 = arith.constant 3.200000e+01 : f32
    %51 = vector.broadcast %cst_27 : f32 to vector<16x1xf32>
    %52 = arith.divf %50, %51 : vector<16x1xf32>
    %53 = arith.mulf %47, %47 : vector<16x1xf32>
    %54 = arith.subf %52, %53 : vector<16x1xf32>
    %cst_28 = arith.constant 0.000000e+00 : f32
    %55 = vector.broadcast %cst_28 : f32 to vector<16x1xf32>
    %56 = arith.maximumf %54, %55 : vector<16x1xf32>
    %cst_29 = arith.constant 9.99999974E-6 : f32
    %57 = vector.broadcast %cst_29 : f32 to vector<16x1xf32>
    %58 = arith.addf %56, %57 : vector<16x1xf32>
    %59 = math.rsqrt %58 : vector<16x1xf32>
    %60 = vector.broadcast %47 : vector<16x1xf32> to vector<16x32xf32>
    %61 = arith.subf %43, %60 : vector<16x32xf32>
    %62 = vector.broadcast %59 : vector<16x1xf32> to vector<16x32xf32>
    %63 = arith.mulf %61, %62 : vector<16x32xf32>
    %64 = vector.broadcast %4 : vector<1x32xf32> to vector<16x32xf32>
    %65 = arith.mulf %63, %64 : vector<16x32xf32>
    %66 = vector.broadcast %5 : vector<1x32xf32> to vector<16x32xf32>
    %67 = arith.addf %65, %66 : vector<16x32xf32>
    %cst_30 = arith.constant 5.000000e-01 : f32
    %68 = vector.broadcast %cst_30 : f32 to vector<16x32xf32>
    %69 = arith.mulf %68, %67 : vector<16x32xf32>
    %70 = math.tanh %69 : vector<16x32xf32>
    %cst_31 = arith.constant 5.000000e-01 : f32
    %71 = vector.broadcast %cst_31 : f32 to vector<16x32xf32>
    %72 = arith.mulf %71, %70 : vector<16x32xf32>
    %cst_32 = arith.constant 5.000000e-01 : f32
    %73 = vector.broadcast %cst_32 : f32 to vector<16x32xf32>
    %74 = arith.addf %72, %73 : vector<16x32xf32>
    %75 = arith.mulf %67, %74 : vector<16x32xf32>
    %c0_33 = arith.constant 0 : index
    %c0_34 = arith.constant 0 : index
    %76 = vector.load %arg4[%c0_33, %c0_34] : memref<32x32xf32, #tpu.memory_space<vmem>>, vector<32x32xf32>
    %cst_35 = arith.constant dense<0.000000e+00> : vector<16x32xf32>
    %77 = tpu.matmul %75, %76, %cst_35 {dimension_numbers = #tpu.dot_dimension_numbers<[1], [0], [0], [1], [0, 0, 1, 1], [], []>} : vector<16x32xf32>, vector<32x32xf32>, vector<16x32xf32> -> vector<16x32xf32>
    %78 = vector.broadcast %6 : vector<1x32xf32> to vector<16x32xf32>
    %79 = arith.addf %77, %78 : vector<16x32xf32>
    %cst_36 = arith.constant dense<0.000000e+00> : vector<16xf32>
    %80 = vector.multi_reduction <add>, %79, %cst_36 [1] : vector<16x32xf32> to vector<16xf32>
    %81 = vector.shape_cast %80 : vector<16xf32> to vector<16x1xf32>
    %cst_37 = arith.constant 3.200000e+01 : f32
    %82 = vector.broadcast %cst_37 : f32 to vector<16x1xf32>
    %83 = arith.divf %81, %82 : vector<16x1xf32>
    %84 = arith.mulf %79, %79 : vector<16x32xf32>
    %cst_38 = arith.constant dense<0.000000e+00> : vector<16xf32>
    %85 = vector.multi_reduction <add>, %84, %cst_38 [1] : vector<16x32xf32> to vector<16xf32>
    %86 = vector.shape_cast %85 : vector<16xf32> to vector<16x1xf32>
    %cst_39 = arith.constant 3.200000e+01 : f32
    %87 = vector.broadcast %cst_39 : f32 to vector<16x1xf32>
    %88 = arith.divf %86, %87 : vector<16x1xf32>
    %89 = arith.mulf %83, %83 : vector<16x1xf32>
    %90 = arith.subf %88, %89 : vector<16x1xf32>
    %cst_40 = arith.constant 0.000000e+00 : f32
    %91 = vector.broadcast %cst_40 : f32 to vector<16x1xf32>
    %92 = arith.maximumf %90, %91 : vector<16x1xf32>
    %cst_41 = arith.constant 9.99999974E-6 : f32
    %93 = vector.broadcast %cst_41 : f32 to vector<16x1xf32>
    %94 = arith.addf %92, %93 : vector<16x1xf32>
    %95 = math.rsqrt %94 : vector<16x1xf32>
    %96 = vector.broadcast %83 : vector<16x1xf32> to vector<16x32xf32>
    %97 = arith.subf %79, %96 : vector<16x32xf32>
    %98 = vector.broadcast %95 : vector<16x1xf32> to vector<16x32xf32>
    %99 = arith.mulf %97, %98 : vector<16x32xf32>
    %100 = vector.broadcast %7 : vector<1x32xf32> to vector<16x32xf32>
    %101 = arith.mulf %99, %100 : vector<16x32xf32>
    %102 = vector.broadcast %8 : vector<1x32xf32> to vector<16x32xf32>
    %103 = arith.addf %101, %102 : vector<16x32xf32>
    %cst_42 = arith.constant 5.000000e-01 : f32
    %104 = vector.broadcast %cst_42 : f32 to vector<16x32xf32>
    %105 = arith.mulf %104, %103 : vector<16x32xf32>
    %106 = math.tanh %105 : vector<16x32xf32>
    %cst_43 = arith.constant 5.000000e-01 : f32
    %107 = vector.broadcast %cst_43 : f32 to vector<16x32xf32>
    %108 = arith.mulf %107, %106 : vector<16x32xf32>
    %cst_44 = arith.constant 5.000000e-01 : f32
    %109 = vector.broadcast %cst_44 : f32 to vector<16x32xf32>
    %110 = arith.addf %108, %109 : vector<16x32xf32>
    %111 = arith.mulf %103, %110 : vector<16x32xf32>
    %cst_45 = arith.constant dense<0.000000e+00> : vector<1x16xf32>
    %112 = tpu.matmul %9, %111, %cst_45 {dimension_numbers = #tpu.dot_dimension_numbers<[1], [1], [0], [0], [0, 0, 1, 0], [], []>} : vector<1x32xf32>, vector<16x32xf32>, vector<1x16xf32> -> vector<1x16xf32>
    %113 = vector.broadcast %10 : vector<1x1xf32> to vector<1x16xf32>
    %114 = arith.addf %112, %113 : vector<1x16xf32>
    %c0_46 = arith.constant 0 : index
    %c0_47 = arith.constant 0 : index
    %115 = vector.load %arg6[%c0_46, %c0_47] : memref<1x16xf32, #tpu.memory_space<vmem>>, vector<1x16xf32>
    tpu.vector_store %arg6[%c0_46, %c0_47], %114 {strides = array<i32>} : memref<1x16xf32, #tpu.memory_space<vmem>>, vector<1x16xf32>,
    return
  }
  func.func @transform_0(%arg0: i32) -> (i32, i32) {
    %c0_i32 = arith.constant 0 : i32
    %c0_i32_0 = arith.constant 0 : i32
    return %arg0, %c0_i32 : i32, i32
  }
  func.func @transform_1(%arg0: i32) -> (i32, i32) {
    %c0_i32 = arith.constant 0 : i32
    %c0_i32_0 = arith.constant 0 : i32
    %c0_i32_1 = arith.constant 0 : i32
    return %c0_i32, %c0_i32_0 : i32, i32
  }
  func.func @transform_2(%arg0: i32) -> (i32, i32) {
    %c0_i32 = arith.constant 0 : i32
    %c0_i32_0 = arith.constant 0 : i32
    %c0_i32_1 = arith.constant 0 : i32
    return %c0_i32, %c0_i32_0 : i32, i32
  }
  func.func @transform_3(%arg0: i32) -> (i32, i32) {
    %c0_i32 = arith.constant 0 : i32
    %c0_i32_0 = arith.constant 0 : i32
    %c0_i32_1 = arith.constant 0 : i32
    return %c0_i32, %c0_i32_0 : i32, i32
  }
  func.func @transform_4(%arg0: i32) -> (i32, i32) {
    %c0_i32 = arith.constant 0 : i32
    %c0_i32_0 = arith.constant 0 : i32
    %c0_i32_1 = arith.constant 0 : i32
    return %c0_i32, %c0_i32_0 : i32, i32
  }
  func.func @transform_5(%arg0: i32) -> (i32, i32) {
    %c0_i32 = arith.constant 0 : i32
    %c0_i32_0 = arith.constant 0 : i32
    return %c0_i32, %arg0 : i32, i32
  }
}

</mosaic_0001>

<bundles_post_ra>
// kernel: termination_predictor.1
= control target key start
LH: loop header
LB: loop body
LE: loop exit
PB: predicated region body
PF: predicated region fallthrough
CT: control target
= control target key end

     0   :  { %10 = vsyncpa [#allocation3], 0  ;;  %s843_s0 = inlined_call_operand.vmem [shape: f32[16,32], index: 0, kind: input, shape index: {}]   ;;  %s844_s1 = inlined_call_operand.vmem [shape: f32[32,32], index: 1, kind: input, shape index: {}]   ;;  %s845_s2 = inlined_call_operand.hbm [shape: f32[32,32], index: 2, kind: input, shape index: {}]   ;;  %s846_s3 = inlined_call_operand.hbm [shape: f32[32,32], index: 3, kind: input, shape index: {}]   ;;  %s847_s4 = inlined_call_operand.vmem [shape: f32[16,32], index: 4, kind: input, shape index: {}]   ;;  %s848_s5 = inlined_call_operand.vmem [shape: f32[1,16], index: 5, kind: output, shape index: {}]  }
   0x1   :  { %11 = vsyncpa [#allocation5], 0  ;;  %s725_s18 = smov [#allocation2]  }
   0x2   :  { %s21_s19 = sshll.u32 %s725_s18, 4  ;;  %s22_s19 = int_to_ptr.vmem [resolvable:$true] %s21_s19 }
   0x3   :  { %s689_s20 = scalar_lea.vmem %s22_s19, 512  ;;  %p694_p1 = scmp.lt.s32.totalorder %s22_s19, %s22_s19 }
   0x4   :  { %p690_p0 = scmp.ne.s32.totalorder %s22_s19, %s689_s20  ;;  %p695_p2 = scmp.lt.s32.totalorder %s689_s20, %s689_s20 }
   0x6   :  { %p696_p3 = por %p695_p2, %p694_p1 }
   0x8   :  { %p697_p4 = pnand %p696_p3, %p690_p0 }
   0xa   :  { %700 = shalt.err (!%p697_p4)
}
   0xb   :  { %s726_s21 = smov 128   ;;  %s727_s22 = smov 8  }
   0xc   :  { %27 = dma.hbm_to_vmem [thread:$0]  %s845_s2, 512, %s22_s19, [#allocation3], %s726_s21, %s726_s21, %s727_s22  }
   0xd   :  { %s728_s25 = smov [#allocation4]  }
   0xe   :  { %s33_s26 = sshll.u32 %s728_s25, 4  ;;  %s34_s26 = int_to_ptr.vmem [resolvable:$true] %s33_s26 }
   0xf   :  { %s709_s27 = scalar_lea.vmem %s34_s26, 512  ;;  %p714_p6 = scmp.lt.s32.totalorder %s34_s26, %s34_s26 }
  0x10   :  { %p710_p5 = scmp.ne.s32.totalorder %s34_s26, %s709_s27  ;;  %p715_p7 = scmp.lt.s32.totalorder %s709_s27, %s709_s27 }
  0x12   :  { %p716_p8 = por %p715_p7, %p714_p6 }
  0x14   :  { %p717_p9 = pnand %p716_p8, %p710_p5 }
  0x16   :  { %720 = shalt.err (!%p717_p9)
}
  0x17   :  { %39 = dma.hbm_to_vmem [thread:$0]  %s846_s3, 512, %s34_s26, [#allocation5], %s726_s21, %s726_s21, %s727_s22  }
  0x18   :  { %721 = dma.done.wait [#allocation3], 512  }
  0x19   :  { %722 = vsyncadd [#allocation3], 4294966784 }
  0x1a   :  { %723 = dma.done.wait [#allocation5], 512  }
  0x1b   :  { %724 = vsyncadd [#allocation5], 4294966784  ;;  %vm69_vm0 = vcmask 261120   ;;  %v64_v0 = vld [vmem:[%s844_s1 + $0x18] sm:$0xff]  ;;  %v63_v1 = vld [vmem:[%s844_s1 + $0x10] sm:$0xff]  ;;  %vm730_vm1 = vmmov 0  }
  0x1c   :  { %613 = vmatprep.subr.mxu0 %v64_v0  ;;  %v59_v2 = vld [vmem:[%s843_s0] sm:$0xff]  ;;  %v62_v3 = vld [vmem:[%s844_s1 + $0x8] sm:$0xff]  ;;  %v199_v17 = vld [vmem:[#allocation2 + $0x18] sm:$0xff]  ;;  %vm566_vm2 = vcmask 122880  }
  0x1d   :  { %614 = vmatpush3.msra.mxu0 %v64_v0  ;;  %621 = vmatprep.mubr.msk.f32.mxu0 %vm69_vm0, %v59_v2  ;;  %v61_v4 = vld [vmem:[%s844_s1] sm:$0xff]  ;;  %v60_v5 = vld [vmem:[%s843_s0 + $0x8] sm:$0xff]  ;;  %v198_v18 = vld [vmem:[#allocation2 + $0x10] sm:$0xff] }
  0x1e   :  { %615 = vmatprep.subr.mxu0 %v63_v1  ;;  %v574_v7 = vld [vmem:[%s847_s4] ss:$0 sm:$0xff]  ;;  %624 = vmatprep.subr.mxu1 %v199_v17  ;;  %v197_v19 = vld [vmem:[#allocation2 + $0x8] sm:$0xff]  ;;  %v577_v39 = vld [vmem:[%s847_s4 + $0x1] ss:$0 sm:$0xff] }
  0x1f   :  { %616 = vmatpush3.msra.mxu0 %v63_v1  ;;  %625 = vmatpush3.msra.mxu1 %v199_v17  ;;  %v196_v20 = vld [vmem:[#allocation2] sm:$0xff]  ;;  %v342_v60 = vld [vmem:[#allocation4 + $0x18] sm:$0xff]  ;;  %v341_v61 = vld [vmem:[#allocation4 + $0x10] sm:$0xff] }
  0x20   :  { %617 = vmatprep.subr.mxu0 %v62_v3  ;;  %626 = vmatprep.subr.mxu1 %v198_v18  ;;  %v578_v41 = vld [vmem:[%s847_s4 + $0x2] ss:$0 sm:$0xff]  ;;  %v579_v49 = vld [vmem:[%s847_s4 + $0x3] ss:$0 sm:$0xff]  ;;  %v340_v62 = vld [vmem:[#allocation4 + $0x8] sm:$0xff] }
  0x21   :  { %618 = vmatpush3.msra.mxu0 %v62_v3  ;;  %627 = vmatpush3.msra.mxu1 %v198_v18  ;;  %v339_v63 = vld [vmem:[#allocation4] sm:$0xff] }
  0x22   :  { %619 = vmatprep.subr.mxu0 %v61_v4  ;;  %628 = vmatprep.subr.mxu1 %v197_v19  ;;  %v582_v18 = vld [vmem:[%s847_s4 + $0x4] ss:$0 sm:$0xff] }
  0x23   :  { %620 = vmatpush3.msra.mxu0 %v61_v4  ;;  %629 = vmatpush3.msra.mxu1 %v197_v19 }
  0x24   :  { %622 = vmatmul.mubr.msk.f32.vlgmr.msra.gmra.mxu0 %vm69_vm0, %v60_v5  ;;  %630 = vmatprep.subr.mxu1 %v196_v20 }
  0x25   :  { %631 = vmatpush3.msra.mxu1 %v196_v20  ;;  %635 = vmatprep.subr.mxu0 %v342_v60 }
  0x26   :  { %636 = vmatpush3.msra.mxu0 %v342_v60 }
  0x27   :  { %637 = vmatprep.subr.mxu0 %v341_v61 }
  0x28   :  { %638 = vmatpush3.msra.mxu0 %v341_v61 }
  0x29   :  { %639 = vmatprep.subr.mxu0 %v340_v62 }
  0x2a   :  { %640 = vmatpush3.msra.mxu0 %v340_v62 }
  0x2b   :  { %641 = vmatprep.subr.mxu0 %v339_v63 }
  0x2c   :  { %642 = vmatpush3.msra.mxu0 %v339_v63 }
  0xe4   :  { %v623_v6 = vpop.f32.mrf.mxu0 }
  0xe5   :  { %v148_v9 = vadd.f32 %v623_v6, %v574_v7 }
  0xe6   :  { %v142_v8 = vpop.f32.mrf.mxu0 }
  0xe7   :  { %v143_v10 = vadd.f32 %v574_v7, %v142_v8  ;;  %v161_v14 = vmul.f32 %v148_v9, %v148_v9  ;;  %v154_v15 = vsel %vm69_vm0, %v148_v9, 0.0 }
  0xe9   :  { %v151_v11 = vsel %vm69_vm0, %v143_v10, 0.0  ;;  %v160_v12 = vmul.f32 %v143_v10, %v143_v10  ;;  %v165_v16 = vsel %vm69_vm0, %v161_v14, 0.0 }
  0xea   :  { %152 = vadd.xlane.f32.xlu0 %v151_v11 }
  0xeb   :  { %v162_v13 = vsel %vm69_vm0, %v160_v12, 0.0 }
  0xec   :  { %163 = vadd.xlane.f32.xlu1 %v162_v13 }
  0xee   :  { %155 = vadd.xlane.f32.xlu0 %v154_v15 }
  0xf0   :  { %166 = vadd.xlane.f32.xlu1 %v165_v16 }
 0x173   :  { %v153_v21 = vpop.xlane.xlu0 %152 }
 0x174   :  { %v158_v22 = vmul.f32 0.03125, %v153_v21 }
 0x175   :  { %v164_v23 = vpop.xlane.xlu1 %163 }
 0x176   :  { %v170_v24 = vmul.f32 %v158_v22, %v158_v22  ;;  %v168_v25 = vmul.f32 0.03125, %v164_v23  ;;  %v180_v37 = vsub.f32 %v143_v10, %v158_v22  ;;  %v583_v22 = vld [vmem:[%s847_s4 + $0x5] ss:$0 sm:$0xff] }
 0x177   :  { %v156_v26 = vpop.xlane.xlu0 %155 }
 0x178   :  { %v172_v27 = vsub.f32 %v168_v25, %v170_v24  ;;  %v159_v28 = vmul.f32 0.03125, %v156_v26 }
 0x179   :  { %v167_v29 = vpop.xlane.xlu1 %166 }
 0x17a   :  { %v174_v30 = vmax.f32 %v172_v27, 0.0  ;;  %v171_v31 = vmul.f32 %v159_v28, %v159_v28  ;;  %v169_v32 = vmul.f32 0.03125, %v167_v29  ;;  %v181_v42 = vsub.f32 %v148_v9, %v159_v28 }
 0x17c   :  { %v176_v33 = vadd.f32 1e-05, %v174_v30  ;;  %v173_v34 = vsub.f32 %v169_v32, %v171_v31 }
 0x17e   :  { %661 = vrsqrt.f32 %v176_v33  ;;  %v175_v35 = vmax.f32 %v173_v34, 0.0 }
 0x180   :  { %v177_v36 = vadd.f32 1e-05, %v175_v35 }
 0x182   :  { %663 = vrsqrt.f32 %v177_v36 }
 0x18b   :  { %v662_v38 = vpop.eup %661 }
 0x18c   :  { %v182_v40 = vmul.f32 %v662_v38, %v180_v37  ;;  %v584_v38 = vld [vmem:[%s847_s4 + $0x6] ss:$0 sm:$0xff] }
 0x18e   :  { %v188_v43 = vmul.f32 %v577_v39, %v182_v40 }
 0x18f   :  { %v664_v44 = vpop.eup %663 }
 0x190   :  { %v183_v45 = vmul.f32 %v664_v44, %v181_v42  ;;  %v194_v46 = vadd.f32 %v578_v41, %v188_v43 }
 0x192   :  { %v189_v47 = vmul.f32 %v577_v39, %v183_v45  ;;  %632 = vmatprep.mubr.msk.f32.mxu1 %vm69_vm0, %v194_v46 }
 0x194   :  { %v195_v48 = vadd.f32 %v578_v41, %v189_v47 }
 0x196   :  { %633 = vmatmul.mubr.msk.f32.vlgmr.msra.gmra.mxu1 %vm69_vm0, %v195_v48 }
 0x256   :  { %v634_v50 = vpop.f32.mrf.mxu1 }
 0x257   :  { %v282_v51 = vadd.f32 %v634_v50, %v579_v49  ;;  %v58_v50 = vld [vmem:[%s847_s4 + $0xa] sm:$0x1] }
 0x258   :  { %v276_v52 = vpop.f32.mrf.mxu1 }
 0x259   :  { %v277_v53 = vadd.f32 %v579_v49, %v276_v52  ;;  %v288_v54 = vsel %vm69_vm0, %v282_v51, 0.0  ;;  %v294_v55 = vmul.f32 %v282_v51, %v282_v51  ;;  %v729_v49 = vmov 0.0  }
 0x25a   :  { %289 = vadd.xlane.f32.xlu1 %v288_v54  ;;  %646 = vmatprep.subr.mxu1 %v729_v49 }
 0x25b   :  { %v285_v56 = vsel %vm69_vm0, %v277_v53, 0.0  ;;  %v293_v57 = vmul.f32 %v277_v53, %v277_v53  ;;  %v298_v58 = vsel %vm69_vm0, %v294_v55, 0.0  ;;  %650 = vmatprep.mubr.msk.f32.mxu1 %vm730_vm1, %v729_v49 }
 0x25c   :  { %286 = vadd.xlane.f32.xlu0 %v285_v56 }
 0x25d   :  { %v295_v59 = vsel %vm69_vm0, %v293_v57, 0.0 }
 0x25e   :  { %299 = vadd.xlane.f32.xlu1 %v298_v58 }
 0x260   :  { %296 = vadd.xlane.f32.xlu0 %v295_v59 }
 0x2e3   :  { %v290_v0 = vpop.xlane.xlu1 %289 }
 0x2e4   :  { %v292_v1 = vmul.f32 0.03125, %v290_v0 }
 0x2e5   :  { %v287_v2 = vpop.xlane.xlu0 %286 }
 0x2e6   :  { %v291_v3 = vmul.f32 0.03125, %v287_v2  ;;  %v304_v5 = vmul.f32 %v292_v1, %v292_v1  ;;  %v314_v16 = vsub.f32 %v282_v51, %v292_v1  ;;  %v731_v51 = vmov 0  }
 0x2e7   :  { %v300_v4 = vpop.xlane.xlu1 %299  ;;  %660 = vset.pattern.permute.xlu0 %v731_v51 }
 0x2e8   :  { %v302_v6 = vmul.f32 0.03125, %v300_v4  ;;  %v303_v8 = vmul.f32 %v291_v3, %v291_v3  ;;  %v313_v19 = vsub.f32 %v277_v53, %v291_v3 }
 0x2e9   :  { %v297_v7 = vpop.xlane.xlu0 %296 }
 0x2ea   :  { %v306_v9 = vsub.f32 %v302_v6, %v304_v5  ;;  %v301_v10 = vmul.f32 0.03125, %v297_v7  ;;  %v587_v6 = vld [vmem:[%s847_s4 + $0x7] ss:$0 sm:$0xff] }
 0x2ec   :  { %v308_v11 = vmax.f32 %v306_v9, 0.0  ;;  %v305_v12 = vsub.f32 %v301_v10, %v303_v8  ;;  %v588_v8 = vld [vmem:[%s847_s4 + $0x8] ss:$0 sm:$0xff] }
 0x2ee   :  { %v310_v13 = vadd.f32 1e-05, %v308_v11  ;;  %v307_v14 = vmax.f32 %v305_v12, 0.0 }
 0x2f0   :  { %665 = vrsqrt.f32 %v310_v13  ;;  %v309_v15 = vadd.f32 1e-05, %v307_v14 }
 0x2f2   :  { %667 = vrsqrt.f32 %v309_v15 }
 0x2fd   :  { %v666_v17 = vpop.eup %665 }
 0x2fe   :  { %v316_v20 = vmul.f32 %v666_v17, %v314_v16 }
 0x2ff   :  { %v668_v21 = vpop.eup %667 }
 0x300   :  { %v315_v23 = vmul.f32 %v668_v21, %v313_v19  ;;  %v322_v24 = vmul.f32 %v582_v18, %v316_v20 }
 0x302   :  { %v321_v25 = vmul.f32 %v582_v18, %v315_v23  ;;  %v328_v26 = vadd.f32 %v583_v22, %v322_v24 }
 0x304   :  { %v327_v27 = vadd.f32 %v583_v22, %v321_v25  ;;  %v330_v28 = vmul.f32 0.5, %v328_v26 }
 0x306   :  { %v329_v29 = vmul.f32 0.5, %v327_v27  ;;  %669 = vtanh.f32 %v330_v28 }
 0x308   :  { %671 = vtanh.f32 %v329_v29 }
 0x313   :  { %v670_v30 = vpop.eup %669 }
 0x314   :  { %v334_v31 = vmul.f32 0.5, %v670_v30 }
 0x315   :  { %v672_v32 = vpop.eup %671 }
 0x316   :  { %v333_v33 = vmul.f32 0.5, %v672_v32  ;;  %v336_v34 = vadd.f32 0.5, %v334_v31 }
 0x318   :  { %v335_v35 = vadd.f32 0.5, %v333_v33  ;;  %v338_v37 = vmul.f32 %v336_v34, %v328_v26  ;;  %v57_v26 = vld [vmem:[%s847_s4 + $0x9] sm:$0x1] }
 0x31a   :  { %v337_v36 = vmul.f32 %v335_v35, %v327_v27 }
 0x31c   :  { %643 = vmatprep.mubr.msk.f32.mxu0 %vm69_vm0, %v337_v36 }
 0x31d   :  { %644 = vmatmul.mubr.msk.f32.vlgmr.msra.gmra.mxu0 %vm69_vm0, %v338_v37 }
 0x3dd   :  { %v645_v39 = vpop.f32.mrf.mxu0 }
 0x3de   :  { %v425_v40 = vadd.f32 %v645_v39, %v584_v38 }
 0x3df   :  { %v419_v41 = vpop.f32.mrf.mxu0 }
 0x3e0   :  { %v420_v42 = vadd.f32 %v584_v38, %v419_v41  ;;  %v431_v43 = vsel %vm69_vm0, %v425_v40, 0.0  ;;  %v437_v44 = vmul.f32 %v425_v40, %v425_v40 }
 0x3e1   :  { %432 = vadd.xlane.f32.xlu0 %v431_v43 }
 0x3e2   :  { %v441_v45 = vsel %vm69_vm0, %v437_v44, 0.0  ;;  %v436_v46 = vmul.f32 %v420_v42, %v420_v42  ;;  %v428_v47 = vsel %vm69_vm0, %v420_v42, 0.0 }
 0x3e3   :  { %442 = vadd.xlane.f32.xlu1 %v441_v45 }
 0x3e4   :  { %v438_v48 = vsel %vm69_vm0, %v436_v46, 0.0 }
 0x3e5   :  { %429 = vadd.xlane.f32.xlu0 %v428_v47 }
 0x3e7   :  { %439 = vadd.xlane.f32.xlu1 %v438_v48 }
 0x3fb   :  { %484 = vperm.xlu0 %660, %v58_v50  }
 0x46a   :  { %v433_v52 = vpop.xlane.xlu0 %432 }
 0x46b   :  { %v435_v53 = vmul.f32 0.03125, %v433_v52 }
 0x46c   :  { %v443_v54 = vpop.xlane.xlu1 %442 }
 0x46d   :  { %v447_v55 = vmul.f32 %v435_v53, %v435_v53  ;;  %v445_v56 = vmul.f32 0.03125, %v443_v54  ;;  %v457_v4 = vsub.f32 %v425_v40, %v435_v53 }
 0x46e   :  { %v430_v57 = vpop.xlane.xlu0 %429 }
 0x46f   :  { %v449_v58 = vsub.f32 %v445_v56, %v447_v55  ;;  %v434_v59 = vmul.f32 0.03125, %v430_v57 }
 0x470   :  { %v440_v60 = vpop.xlane.xlu1 %439 }
 0x471   :  { %v451_v61 = vmax.f32 %v449_v58, 0.0  ;;  %v446_v62 = vmul.f32 %v434_v59, %v434_v59  ;;  %v444_v63 = vmul.f32 0.03125, %v440_v60  ;;  %v456_v9 = vsub.f32 %v420_v42, %v434_v59 }
 0x473   :  { %v453_v0 = vadd.f32 1e-05, %v451_v61  ;;  %v448_v1 = vsub.f32 %v444_v63, %v446_v62 }
 0x475   :  { %673 = vrsqrt.f32 %v453_v0  ;;  %v450_v2 = vmax.f32 %v448_v1, 0.0 }
 0x476   :  { %v485_v27 = vpop.permute.xlu0 %484 }
 0x477   :  { %v452_v3 = vadd.f32 1e-05, %v450_v2 }
 0x479   :  { %675 = vrsqrt.f32 %v452_v3 }
 0x482   :  { %v674_v5 = vpop.eup %673 }
 0x483   :  { %v459_v7 = vmul.f32 %v674_v5, %v457_v4 }
 0x485   :  { %v465_v10 = vmul.f32 %v587_v6, %v459_v7 }
 0x486   :  { %v676_v11 = vpop.eup %675 }
 0x487   :  { %v458_v12 = vmul.f32 %v676_v11, %v456_v9  ;;  %v471_v13 = vadd.f32 %v588_v8, %v465_v10 }
 0x489   :  { %v473_v14 = vmul.f32 0.5, %v471_v13  ;;  %v464_v15 = vmul.f32 %v587_v6, %v458_v12 }
 0x48b   :  { %677 = vtanh.f32 %v473_v14  ;;  %v470_v16 = vadd.f32 %v588_v8, %v464_v15 }
 0x48d   :  { %v472_v17 = vmul.f32 0.5, %v470_v16 }
 0x48f   :  { %679 = vtanh.f32 %v472_v17 }
 0x498   :  { %v678_v18 = vpop.eup %677 }
 0x499   :  { %v477_v19 = vmul.f32 0.5, %v678_v18 }
 0x49b   :  { %v479_v20 = vadd.f32 0.5, %v477_v19 }
 0x49c   :  { %v680_v21 = vpop.eup %679 }
 0x49d   :  { %v481_v22 = vmul.f32 %v479_v20, %v471_v13  ;;  %v476_v23 = vmul.f32 0.5, %v680_v21 }
 0x49f   :  { %647 = vmatpush3.xpose.msk.msra.mxu1 %vm69_vm0, %v481_v22  ;;  %v478_v24 = vadd.f32 0.5, %v476_v23 }
 0x4a0   :  { %648 = vmatprep.subr.mxu1 %v729_v49 }
 0x4a1   :  { %v480_v25 = vmul.f32 %v478_v24, %v470_v16 }
 0x4a3   :  { %649 = vmatpush3.xpose.msk.msra.mxu1 %vm69_vm0, %v480_v25 }
 0x4a6   :  { %651 = vmatmul.mubr.msk.f32.vlgmr.msra.gmra.mxu1 %vm69_vm0, %v57_v26 }
 0x566   :  { %v562_v28 = vpop.f32.mrf.mxu1 }
 0x567   :  { %v563_v29 = vadd.f32 %v562_v28, %v485_v27 }
 0x568   :  { %v652_v30 = vpop.f32.mrf.mxu1 }
 0x569   :  { %567 = vst.msk [vmem:[%s848_s5] sm:$0x1] %vm566_vm2, %v563_v29 }
 0x56a   :  { %572 = vsyncpa [#allocation3], 1 }
 0x56b   :  { %573 = vsyncpa [#allocation5], 1 }

// kernel: termination_predictor.1
= control target key start
LH: loop header
LB: loop body
LE: loop exit
PB: predicated region body
PF: predicated region fallthrough
CT: control target
= control target key end

     0   :  { %10 = vsyncpa [#allocation3], 0  ;;  %s843_s0 = inlined_call_operand.vmem [shape: f32[16,32], index: 0, kind: input, shape index: {}]   ;;  %s844_s1 = inlined_call_operand.vmem [shape: f32[32,32], index: 1, kind: input, shape index: {}]   ;;  %s845_s2 = inlined_call_operand.hbm [shape: f32[32,32], index: 2, kind: input, shape index: {}]   ;;  %s846_s3 = inlined_call_operand.hbm [shape: f32[32,32], index: 3, kind: input, shape index: {}]   ;;  %s847_s4 = inlined_call_operand.vmem [shape: f32[16,32], index: 4, kind: input, shape index: {}]   ;;  %s848_s5 = inlined_call_operand.vmem [shape: f32[1,16], index: 5, kind: output, shape index: {}]  }
   0x1   :  { %11 = vsyncpa [#allocation5], 0  ;;  %s725_s18 = smov [#allocation2]  }
   0x2   :  { %s21_s19 = sshll.u32 %s725_s18, 4  ;;  %s22_s19 = int_to_ptr.vmem [resolvable:$true] %s21_s19 }
   0x3   :  { %s689_s20 = scalar_lea.vmem %s22_s19, 512  ;;  %p694_p1 = scmp.lt.s32.totalorder %s22_s19, %s22_s19 }
   0x4   :  { %p690_p0 = scmp.ne.s32.totalorder %s22_s19, %s689_s20  ;;  %p695_p2 = scmp.lt.s32.totalorder %s689_s20, %s689_s20 }
   0x6   :  { %p696_p3 = por %p695_p2, %p694_p1 }
   0x8   :  { %p697_p4 = pnand %p696_p3, %p690_p0 }
   0xa   :  { %700 = shalt.err (!%p697_p4)
}
   0xb   :  { %s726_s21 = smov 128   ;;  %s727_s22 = smov 8  }
   0xc   :  { %27 = dma.hbm_to_vmem [thread:$0]  %s845_s2, 512, %s22_s19, [#allocation3], %s726_s21, %s726_s21, %s727_s22  }
   0xd   :  { %s728_s25 = smov [#allocation4]  }
   0xe   :  { %s33_s26 = sshll.u32 %s728_s25, 4  ;;  %s34_s26 = int_to_ptr.vmem [resolvable:$true] %s33_s26 }
   0xf   :  { %s709_s27 = scalar_lea.vmem %s34_s26, 512  ;;  %p714_p6 = scmp.lt.s32.totalorder %s34_s26, %s34_s26 }
  0x10   :  { %p710_p5 = scmp.ne.s32.totalorder %s34_s26, %s709_s27  ;;  %p715_p7 = scmp.lt.s32.totalorder %s709_s27, %s709_s27 }
  0x12   :  { %p716_p8 = por %p715_p7, %p714_p6 }
  0x14   :  { %p717_p9 = pnand %p716_p8, %p710_p5 }
  0x16   :  { %720 = shalt.err (!%p717_p9)
}
  0x17   :  { %39 = dma.hbm_to_vmem [thread:$0]  %s846_s3, 512, %s34_s26, [#allocation5], %s726_s21, %s726_s21, %s727_s22  }
  0x18   :  { %721 = dma.done.wait [#allocation3], 512  }
  0x19   :  { %722 = vsyncadd [#allocation3], 4294966784 }
  0x1a   :  { %723 = dma.done.wait [#allocation5], 512  }
  0x1b   :  { %724 = vsyncadd [#allocation5], 4294966784  ;;  %vm69_vm0 = vcmask 261120   ;;  %v64_v0 = vld [vmem:[%s844_s1 + $0x18] sm:$0xff]  ;;  %v63_v1 = vld [vmem:[%s844_s1 + $0x10] sm:$0xff]  ;;  %vm730_vm1 = vmmov 0  }
  0x1c   :  { %613 = vmatprep.subr.mxu0 %v64_v0  ;;  %v59_v2 = vld [vmem:[%s843_s0] sm:$0xff]  ;;  %v62_v3 = vld [vmem:[%s844_s1 + $0x8] sm:$0xff]  ;;  %v199_v17 = vld [vmem:[#allocation2 + $0x18] sm:$0xff]  ;;  %vm566_vm2 = vcmask 122880  }
  0x1d   :  { %614 = vmatpush3.msra.mxu0 %v64_v0  ;;  %621 = vmatprep.mubr.msk.f32.mxu0 %vm69_vm0, %v59_v2  ;;  %v61_v4 = vld [vmem:[%s844_s1] sm:$0xff]  ;;  %v60_v5 = vld [vmem:[%s843_s0 + $0x8] sm:$0xff]  ;;  %v198_v18 = vld [vmem:[#allocation2 + $0x10] sm:$0xff] }
  0x1e   :  { %615 = vmatprep.subr.mxu0 %v63_v1  ;;  %v574_v7 = vld [vmem:[%s847_s4] ss:$0 sm:$0xff]  ;;  %624 = vmatprep.subr.mxu1 %v199_v17  ;;  %v197_v19 = vld [vmem:[#allocation2 + $0x8] sm:$0xff]  ;;  %v577_v39 = vld [vmem:[%s847_s4 + $0x1] ss:$0 sm:$0xff] }
  0x1f   :  { %616 = vmatpush3.msra.mxu0 %v63_v1  ;;  %625 = vmatpush3.msra.mxu1 %v199_v17  ;;  %v196_v20 = vld [vmem:[#allocation2] sm:$0xff]  ;;  %v342_v60 = vld [vmem:[#allocation4 + $0x18] sm:$0xff]  ;;  %v341_v61 = vld [vmem:[#allocation4 + $0x10] sm:$0xff] }
  0x20   :  { %617 = vmatprep.subr.mxu0 %v62_v3  ;;  %626 = vmatprep.subr.mxu1 %v198_v18  ;;  %v578_v41 = vld [vmem:[%s847_s4 + $0x2] ss:$0 sm:$0xff]  ;;  %v579_v49 = vld [vmem:[%s847_s4 + $0x3] ss:$0 sm:$0xff]  ;;  %v340_v62 = vld [vmem:[#allocation4 + $0x8] sm:$0xff] }
  0x21   :  { %618 = vmatpush3.msra.mxu0 %v62_v3  ;;  %627 = vmatpush3.msra.mxu1 %v198_v18  ;;  %v339_v63 = vld [vmem:[#allocation4] sm:$0xff] }
  0x22   :  { %619 = vmatprep.subr.mxu0 %v61_v4  ;;  %628 = vmatprep.subr.mxu1 %v197_v19  ;;  %v582_v18 = vld [vmem:[%s847_s4 + $0x4] ss:$0 sm:$0xff] }
  0x23   :  { %620 = vmatpush3.msra.mxu0 %v61_v4  ;;  %629 = vmatpush3.msra.mxu1 %v197_v19 }
  0x24   :  { %622 = vmatmul.mubr.msk.f32.vlgmr.msra.gmra.mxu0 %vm69_vm0, %v60_v5  ;;  %630 = vmatprep.subr.mxu1 %v196_v20 }
  0x25   :  { %631 = vmatpush3.msra.mxu1 %v196_v20  ;;  %635 = vmatprep.subr.mxu0 %v342_v60 }
  0x26   :  { %636 = vmatpush3.msra.mxu0 %v342_v60 }
  0x27   :  { %637 = vmatprep.subr.mxu0 %v341_v61 }
  0x28   :  { %638 = vmatpush3.msra.mxu0 %v341_v61 }
  0x29   :  { %639 = vmatprep.subr.mxu0 %v340_v62 }
  0x2a   :  { %640 = vmatpush3.msra.mxu0 %v340_v62 }
  0x2b   :  { %641 = vmatprep.subr.mxu0 %v339_v63 }
  0x2c   :  { %642 = vmatpush3.msra.mxu0 %v339_v63 }
  0xe4   :  { %v623_v6 = vpop.f32.mrf.mxu0 }
  0xe5   :  { %v148_v9 = vadd.f32 %v623_v6, %v574_v7 }
  0xe6   :  { %v142_v8 = vpop.f32.mrf.mxu0 }
  0xe7   :  { %v143_v10 = vadd.f32 %v574_v7, %v142_v8  ;;  %v161_v14 = vmul.f32 %v148_v9, %v148_v9  ;;  %v154_v15 = vsel %vm69_vm0, %v148_v9, 0.0 }
  0xe9   :  { %v151_v11 = vsel %vm69_vm0, %v143_v10, 0.0  ;;  %v160_v12 = vmul.f32 %v143_v10, %v143_v10  ;;  %v165_v16 = vsel %vm69_vm0, %v161_v14, 0.0 }
  0xea   :  { %152 = vadd.xlane.f32.xlu0 %v151_v11 }
  0xeb   :  { %v162_v13 = vsel %vm69_vm0, %v160_v12, 0.0 }
  0xec   :  { %163 = vadd.xlane.f32.xlu1 %v162_v13 }
  0xee   :  { %155 = vadd.xlane.f32.xlu0 %v154_v15 }
  0xf0   :  { %166 = vadd.xlane.f32.xlu1 %v165_v16 }
 0x173   :  { %v153_v21 = vpop.xlane.xlu0 %152 }
 0x174   :  { %v158_v22 = vmul.f32 0.03125, %v153_v21 }
 0x175   :  { %v164_v23 = vpop.xlane.xlu1 %163 }
 0x176   :  { %v170_v24 = vmul.f32 %v158_v22, %v158_v22  ;;  %v168_v25 = vmul.f32 0.03125, %v164_v23  ;;  %v180_v37 = vsub.f32 %v143_v10, %v158_v22  ;;  %v583_v22 = vld [vmem:[%s847_s4 + $0x5] ss:$0 sm:$0xff] }
 0x177   :  { %v156_v26 = vpop.xlane.xlu0 %155 }
 0x178   :  { %v172_v27 = vsub.f32 %v168_v25, %v170_v24  ;;  %v159_v28 = vmul.f32 0.03125, %v156_v26 }
 0x179   :  { %v167_v29 = vpop.xlane.xlu1 %166 }
 0x17a   :  { %v174_v30 = vmax.f32 %v172_v27, 0.0  ;;  %v171_v31 = vmul.f32 %v159_v28, %v159_v28  ;;  %v169_v32 = vmul.f32 0.03125, %v167_v29  ;;  %v181_v42 = vsub.f32 %v148_v9, %v159_v28 }
 0x17c   :  { %v176_v33 = vadd.f32 1e-05, %v174_v30  ;;  %v173_v34 = vsub.f32 %v169_v32, %v171_v31 }
 0x17e   :  { %661 = vrsqrt.f32 %v176_v33  ;;  %v175_v35 = vmax.f32 %v173_v34, 0.0 }
 0x180   :  { %v177_v36 = vadd.f32 1e-05, %v175_v35 }
 0x182   :  { %663 = vrsqrt.f32 %v177_v36 }
 0x18b   :  { %v662_v38 = vpop.eup %661 }
 0x18c   :  { %v182_v40 = vmul.f32 %v662_v38, %v180_v37  ;;  %v584_v38 = vld [vmem:[%s847_s4 + $0x6] ss:$0 sm:$0xff] }
 0x18e   :  { %v188_v43 = vmul.f32 %v577_v39, %v182_v40 }
 0x18f   :  { %v664_v44 = vpop.eup %663 }
 0x190   :  { %v183_v45 = vmul.f32 %v664_v44, %v181_v42  ;;  %v194_v46 = vadd.f32 %v578_v41, %v188_v43 }
 0x192   :  { %v189_v47 = vmul.f32 %v577_v39, %v183_v45  ;;  %632 = vmatprep.mubr.msk.f32.mxu1 %vm69_vm0, %v194_v46 }
 0x194   :  { %v195_v48 = vadd.f32 %v578_v41, %v189_v47 }
 0x196   :  { %633 = vmatmul.mubr.msk.f32.vlgmr.msra.gmra.mxu1 %vm69_vm0, %v195_v48 }
 0x256   :  { %v634_v50 = vpop.f32.mrf.mxu1 }
 0x257   :  { %v282_v51 = vadd.f32 %v634_v50, %v579_v49  ;;  %v58_v50 = vld [vmem:[%s847_s4 + $0xa] sm:$0x1] }
 0x258   :  { %v276_v52 = vpop.f32.mrf.mxu1 }
 0x259   :  { %v277_v53 = vadd.f32 %v579_v49, %v276_v52  ;;  %v288_v54 = vsel %vm69_vm0, %v282_v51, 0.0  ;;  %v294_v55 = vmul.f32 %v282_v51, %v282_v51  ;;  %v729_v49 = vmov 0.0  }
 0x25a   :  { %289 = vadd.xlane.f32.xlu1 %v288_v54  ;;  %646 = vmatprep.subr.mxu1 %v729_v49 }
 0x25b   :  { %v285_v56 = vsel %vm69_vm0, %v277_v53, 0.0  ;;  %v293_v57 = vmul.f32 %v277_v53, %v277_v53  ;;  %v298_v58 = vsel %vm69_vm0, %v294_v55, 0.0  ;;  %650 = vmatprep.mubr.msk.f32.mxu1 %vm730_vm1, %v729_v49 }
 0x25c   :  { %286 = vadd.xlane.f32.xlu0 %v285_v56 }
 0x25d   :  { %v295_v59 = vsel %vm69_vm0, %v293_v57, 0.0 }
 0x25e   :  { %299 = vadd.xlane.f32.xlu1 %v298_v58 }
 0x260   :  { %296 = vadd.xlane.f32.xlu0 %v295_v59 }
 0x2e3   :  { %v290_v0 = vpop.xlane.xlu1 %289 }
 0x2e4   :  { %v292_v1 = vmul.f32 0.03125, %v290_v0 }
 0x2e5   :  { %v287_v2 = vpop.xlane.xlu0 %286 }
 0x2e6   :  { %v291_v3 = vmul.f32 0.03125, %v287_v2  ;;  %v304_v5 = vmul.f32 %v292_v1, %v292_v1  ;;  %v314_v16 = vsub.f32 %v282_v51, %v292_v1  ;;  %v731_v51 = vmov 0  }
 0x2e7   :  { %v300_v4 = vpop.xlane.xlu1 %299  ;;  %660 = vset.pattern.permute.xlu0 %v731_v51 }
 0x2e8   :  { %v302_v6 = vmul.f32 0.03125, %v300_v4  ;;  %v303_v8 = vmul.f32 %v291_v3, %v291_v3  ;;  %v313_v19 = vsub.f32 %v277_v53, %v291_v3 }
 0x2e9   :  { %v297_v7 = vpop.xlane.xlu0 %296 }
 0x2ea   :  { %v306_v9 = vsub.f32 %v302_v6, %v304_v5  ;;  %v301_v10 = vmul.f32 0.03125, %v297_v7  ;;  %v587_v6 = vld [vmem:[%s847_s4 + $0x7] ss:$0 sm:$0xff] }
 0x2ec   :  { %v308_v11 = vmax.f32 %v306_v9, 0.0  ;;  %v305_v12 = vsub.f32 %v301_v10, %v303_v8  ;;  %v588_v8 = vld [vmem:[%s847_s4 + $0x8] ss:$0 sm:$0xff] }
 0x2ee   :  { %v310_v13 = vadd.f32 1e-05, %v308_v11  ;;  %v307_v14 = vmax.f32 %v305_v12, 0.0 }
 0x2f0   :  { %665 = vrsqrt.f32 %v310_v13  ;;  %v309_v15 = vadd.f32 1e-05, %v307_v14 }
 0x2f2   :  { %667 = vrsqrt.f32 %v309_v15 }
 0x2fd   :  { %v666_v17 = vpop.eup %665 }
 0x2fe   :  { %v316_v20 = vmul.f32 %v666_v17, %v314_v16 }
 0x2ff   :  { %v668_v21 = vpop.eup %667 }
 0x300   :  { %v315_v23 = vmul.f32 %v668_v21, %v313_v19  ;;  %v322_v24 = vmul.f32 %v582_v18, %v316_v20 }
 0x302   :  { %v321_v25 = vmul.f32 %v582_v18, %v315_v23  ;;  %v328_v26 = vadd.f32 %v583_v22, %v322_v24 }
 0x304   :  { %v327_v27 = vadd.f32 %v583_v22, %v321_v25  ;;  %v330_v28 = vmul.f32 0.5, %v328_v26 }
 0x306   :  { %v329_v29 = vmul.f32 0.5, %v327_v27  ;;  %669 = vtanh.f32 %v330_v28 }
 0x308   :  { %671 = vtanh.f32 %v329_v29 }
 0x313   :  { %v670_v30 = vpop.eup %669 }
 0x314   :  { %v334_v31 = vmul.f32 0.5, %v670_v30 }
 0x315   :  { %v672_v32 = vpop.eup %671 }
 0x316   :  { %v333_v33 = vmul.f32 0.5, %v672_v32  ;;  %v336_v34 = vadd.f32 0.5, %v334_v31 }
 0x318   :  { %v335_v35 = vadd.f32 0.5, %v333_v33  ;;  %v338_v37 = vmul.f32 %v336_v34, %v328_v26  ;;  %v57_v26 = vld [vmem:[%s847_s4 + $0x9] sm:$0x1] }
 0x31a   :  { %v337_v36 = vmul.f32 %v335_v35, %v327_v27 }
 0x31c   :  { %643 = vmatprep.mubr.msk.f32.mxu0 %vm69_vm0, %v337_v36 }
 0x31d   :  { %644 = vmatmul.mubr.msk.f32.vlgmr.msra.gmra.mxu0 %vm69_vm0, %v338_v37 }
 0x3dd   :  { %v645_v39 = vpop.f32.mrf.mxu0 }
 0x3de   :  { %v425_v40 = vadd.f32 %v645_v39, %v584_v38 }
 0x3df   :  { %v419_v41 = vpop.f32.mrf.mxu0 }
 0x3e0   :  { %v420_v42 = vadd.f32 %v584_v38, %v419_v41  ;;  %v431_v43 = vsel %vm69_vm0, %v425_v40, 0.0  ;;  %v437_v44 = vmul.f32 %v425_v40, %v425_v40 }
 0x3e1   :  { %432 = vadd.xlane.f32.xlu0 %v431_v43 }
 0x3e2   :  { %v441_v45 = vsel %vm69_vm0, %v437_v44, 0.0  ;;  %v436_v46 = vmul.f32 %v420_v42, %v420_v42  ;;  %v428_v47 = vsel %vm69_vm0, %v420_v42, 0.0 }
 0x3e3   :  { %442 = vadd.xlane.f32.xlu1 %v441_v45 }
 0x3e4   :  { %v438_v48 = vsel %vm69_vm0, %v436_v46, 0.0 }
 0x3e5   :  { %429 = vadd.xlane.f32.xlu0 %v428_v47 }
 0x3e7   :  { %439 = vadd.xlane.f32.xlu1 %v438_v48 }
 0x3fb   :  { %484 = vperm.xlu0 %660, %v58_v50  }
 0x46a   :  { %v433_v52 = vpop.xlane.xlu0 %432 }
 0x46b   :  { %v435_v53 = vmul.f32 0.03125, %v433_v52 }
 0x46c   :  { %v443_v54 = vpop.xlane.xlu1 %442 }
 0x46d   :  { %v447_v55 = vmul.f32 %v435_v53, %v435_v53  ;;  %v445_v56 = vmul.f32 0.03125, %v443_v54  ;;  %v457_v4 = vsub.f32 %v425_v40, %v435_v53 }
 0x46e   :  { %v430_v57 = vpop.xlane.xlu0 %429 }
 0x46f   :  { %v449_v58 = vsub.f32 %v445_v56, %v447_v55  ;;  %v434_v59 = vmul.f32 0.03125, %v430_v57 }
 0x470   :  { %v440_v60 = vpop.xlane.xlu1 %439 }
 0x471   :  { %v451_v61 = vmax.f32 %v449_v58, 0.0  ;;  %v446_v62 = vmul.f32 %v434_v59, %v434_v59  ;;  %v444_v63 = vmul.f32 0.03125, %v440_v60  ;;  %v456_v9 = vsub.f32 %v420_v42, %v434_v59 }
 0x473   :  { %v453_v0 = vadd.f32 1e-05, %v451_v61  ;;  %v448_v1 = vsub.f32 %v444_v63, %v446_v62 }
 0x475   :  { %673 = vrsqrt.f32 %v453_v0  ;;  %v450_v2 = vmax.f32 %v448_v1, 0.0 }
 0x476   :  { %v485_v27 = vpop.permute.xlu0 %484 }
 0x477   :  { %v452_v3 = vadd.f32 1e-05, %v450_v2 }
 0x479   :  { %675 = vrsqrt.f32 %v452_v3 }
 0x482   :  { %v674_v5 = vpop.eup %673 }
 0x483   :  { %v459_v7 = vmul.f32 %v674_v5, %v457_v4 }
 0x485   :  { %v465_v10 = vmul.f32 %v587_v6, %v459_v7 }
 0x486   :  { %v676_v11 = vpop.eup %675 }
 0x487   :  { %v458_v12 = vmul.f32 %v676_v11, %v456_v9  ;;  %v471_v13 = vadd.f32 %v588_v8, %v465_v10 }
 0x489   :  { %v473_v14 = vmul.f32 0.5, %v471_v13  ;;  %v464_v15 = vmul.f32 %v587_v6, %v458_v12 }
 0x48b   :  { %677 = vtanh.f32 %v473_v14  ;;  %v470_v16 = vadd.f32 %v588_v8, %v464_v15 }
 0x48d   :  { %v472_v17 = vmul.f32 0.5, %v470_v16 }
 0x48f   :  { %679 = vtanh.f32 %v472_v17 }
 0x498   :  { %v678_v18 = vpop.eup %677 }
 0x499   :  { %v477_v19 = vmul.f32 0.5, %v678_v18 }
 0x49b   :  { %v479_v20 = vadd.f32 0.5, %v477_v19 }
 0x49c   :  { %v680_v21 = vpop.eup %679 }
 0x49d   :  { %v481_v22 = vmul.f32 %v479_v20, %v471_v13  ;;  %v476_v23 = vmul.f32 0.5, %v680_v21 }
 0x49f   :  { %647 = vmatpush3.xpose.msk.msra.mxu1 %vm69_vm0, %v481_v22  ;;  %v478_v24 = vadd.f32 0.5, %v476_v23 }
 0x4a0   :  { %648 = vmatprep.subr.mxu1 %v729_v49 }
 0x4a1   :  { %v480_v25 = vmul.f32 %v478_v24, %v470_v16 }
 0x4a3   :  { %649 = vmatpush3.xpose.msk.msra.mxu1 %vm69_vm0, %v480_v25 }
 0x4a6   :  { %651 = vmatmul.mubr.msk.f32.vlgmr.msra.gmra.mxu1 %vm69_vm0, %v57_v26 }
 0x566   :  { %v562_v28 = vpop.f32.mrf.mxu1 }
 0x567   :  { %v563_v29 = vadd.f32 %v562_v28, %v485_v27 }
 0x568   :  { %v652_v30 = vpop.f32.mrf.mxu1 }
 0x569   :  { %567 = vst.msk [vmem:[%s848_s5] sm:$0x1] %vm566_vm2, %v563_v29 }
 0x56a   :  { %572 = vsyncpa [#allocation3], 1 }
 0x56b   :  { %573 = vsyncpa [#allocation5], 1 }

</bundles_post_ra>
